<compile_context>
chip_gen: v7x
topology: tpu7x:2x2x1
jax: 0.10.0
libtpu: 0.0.40
codegen_flags: <defaults>
</compile_context>

<pallas_src>
import functools

import jax
import jax.numpy as jnp
from jax.experimental import pallas as pl
from jax.experimental.pallas import tpu as pltpu

_LANE_CHOICES = (512, 256, 128)          # lane-dense last dim (multiple of 128)
_PER_STEP_BYTES = 8 * 1024 * 1024        # in + out footprint of ONE buffer set
_VMEM_LIMIT_BYTES = 32 * 1024 * 1024     # 2x double-buffered footprint + slack


# --------------------------------------------------------------------------
# Kernel bodies
# --------------------------------------------------------------------------
def _gaussian_body(x_ref, o_ref, *, mu, scale):
    # Elementwise exp((x - mu)^2 * scale), scale = -1/(2*sigma^2).
    # Upcast to f32 so bf16/f16 inputs follow fp32 torch semantics; sub/mul on
    # the VPU, exp on the EUP.
    x = x_ref[...].astype(jnp.float32)
    d = x - mu
    o_ref[...] = jnp.exp(d * d * scale).astype(o_ref.dtype)


def _gaussian_bank_body(x_ref, o_ref, *, mus, scales):
    # Fused k-NRM kernel bank: one HBM read of x, K Gaussian outputs.
    x = x_ref[...].astype(jnp.float32)
    for k in range(len(mus)):            # K is small & static -> unrolled
        d = x - mus[k]
        o_ref[k, ...] = jnp.exp(d * d * scales[k]).astype(o_ref.dtype)


# --------------------------------------------------------------------------
# Tiling helpers
# --------------------------------------------------------------------------
def _choose_lanes(total: int):
    """Largest lane width in {512,256,128} dividing total (no pad), else pad."""
    for lanes in _LANE_CHOICES:
        if total % lanes == 0:
            return lanes, False
    return 128, True


def _choose_block_rows(rows: int, per_row_bytes: int) -> int:
    """Row-tile size: ~_PER_STEP_BYTES per step, >= 2 blocks when non-trivial."""
    cap = max(8, (_PER_STEP_BYTES // per_row_bytes) // 8 * 8)
    if rows <= 8:
        return rows                       # full-extent block (valid per (8,128) rule)
    half = -(-(-(-rows // 2)) // 8) * 8   # ceil(ceil(rows/2) / 8) * 8
    return min(cap, half)                 # guarantees >= 2 blocks (v7x megacore)


def _to_slab(x: jax.Array):
    """Flatten x into a lane-dense (rows, lanes) slab (pad only if ragged)."""
    total = x.size
    lanes, need_pad = _choose_lanes(total)
    xf = x.reshape(-1)
    padded_total = total
    if need_pad:
        padded_total = -(-total // lanes) * lanes
        xf = jnp.pad(xf, (0, padded_total - total))
    rows = padded_total // lanes
    return xf.reshape(rows, lanes), rows, lanes, total, padded_total


# --------------------------------------------------------------------------
# Public wrappers
# --------------------------------------------------------------------------
def gaussian_kernel(x: jax.Array, mu: float = 1.0, sigma: float = 1.0) -> jax.Array:
    """Elementwise Gaussian RBF kernel: exp(-(x - mu)^2 / (2*sigma^2))."""
    orig_shape, orig_dtype = x.shape, x.dtype
    mu_f = float(mu)
    scale_f = -1.0 / (2.0 * float(sigma) * float(sigma))

    x2, rows, lanes, total, padded_total = _to_slab(x)
    itemsize = jnp.dtype(orig_dtype).itemsize
    block_rows = _choose_block_rows(rows, lanes * 2 * itemsize)  # in + out rows
    grid = (pl.cdiv(rows, block_rows),)

    out2 = pl.pallas_call(
        functools.partial(_gaussian_body, mu=mu_f, scale=scale_f),
        out_shape=jax.ShapeDtypeStruct((rows, lanes), orig_dtype),
        grid_spec=pltpu.PrefetchScalarGridSpec(
            num_scalar_prefetch=0,
            grid=grid,
            in_specs=[pl.BlockSpec((block_rows, lanes), lambda i: (i, 0))],
            out_specs=pl.BlockSpec((block_rows, lanes), lambda i: (i, 0)),
        ),
        compiler_params=pltpu.CompilerParams(
            dimension_semantics=("parallel",),
            vmem_limit_bytes=_VMEM_LIMIT_BYTES,
        ),
        cost_estimate=pl.CostEstimate(
            flops=3 * total,
            transcendentals=total,
            bytes_accessed=2 * total * itemsize,
        ),
    )(x2)

    out = out2.reshape(-1)
    if padded_total != total:
        out = out[:total]
    return out.reshape(orig_shape)


def gaussian_kernel_bank(x: jax.Array, mus, sigmas) -> jax.Array:
    """Fused k-NRM kernel bank: stack_k exp(-(x - mu_k)^2 / (2*sigma_k^2)).

    Reads x from HBM once for all K (mu, sigma) pairs.  Returns (K, *x.shape).
    """
    assert len(mus) == len(sigmas) and len(mus) >= 1
    orig_shape, orig_dtype = x.shape, x.dtype
    K = len(mus)
    mus_f = tuple(float(m) for m in mus)
    scales_f = tuple(-1.0 / (2.0 * float(s) * float(s)) for s in sigmas)

    x2, rows, lanes, total, padded_total = _to_slab(x)
    itemsize = jnp.dtype(orig_dtype).itemsize
    block_rows = _choose_block_rows(rows, lanes * (1 + K) * itemsize)
    grid = (pl.cdiv(rows, block_rows),)

    out3 = pl.pallas_call(
        functools.partial(_gaussian_bank_body, mus=mus_f, scales=scales_f),
        out_shape=jax.ShapeDtypeStruct((K, rows, lanes), orig_dtype),
        grid_spec=pltpu.PrefetchScalarGridSpec(
            num_scalar_prefetch=0,
            grid=grid,
            in_specs=[pl.BlockSpec((block_rows, lanes), lambda i: (i, 0))],
            out_specs=pl.BlockSpec((K, block_rows, lanes), lambda i: (0, i, 0)),
        ),
        compiler_params=pltpu.CompilerParams(
            dimension_semantics=("parallel",),
            vmem_limit_bytes=_VMEM_LIMIT_BYTES,
        ),
        cost_estimate=pl.CostEstimate(
            flops=3 * total * K,
            transcendentals=total * K,
            bytes_accessed=(1 + K) * total * itemsize,
        ),
    )(x2)
    # TODO(synk): fusing the k-NRM doc-axis pooling sum into this pass would
    # additionally shrink output traffic from B*q*d*K to B*q*K.

    out = out3.reshape(K, -1)
    if padded_total != total:
        out = out[:, :total]
    return out.reshape((K,) + orig_shape)


if __name__ == "__main__":
    key = jax.random.PRNGKey(0)
    # k-NRM translation (similarity) matrix: batch=2, query_len=8, doc_len=128
    x = jax.random.uniform(key, (2, 8, 128), dtype=jnp.float32,
                           minval=-1.0, maxval=1.0)

    # Single-(mu, sigma) module — exact PyTorch GaussianKernel semantics.
    mu, sigma = 1.0, 1.0
    out = jax.block_until_ready(gaussian_kernel(x, mu=mu, sigma=sigma))
    ref = jnp.exp(-((x - mu) ** 2) / (2.0 * sigma ** 2))
    assert out.shape == x.shape and out.dtype == x.dtype
    assert jnp.allclose(out, ref, atol=1e-6, rtol=1e-5)

    # Fused bank: all K k-NRM kernels in one HBM pass.
    mus = [1.0, 0.9, 0.7, 0.5, 0.3, 0.1, -0.1, -0.3, -0.5, -0.7, -0.9]
    sigmas = [1e-3] + [0.1] * 10
    outs = jax.block_until_ready(gaussian_kernel_bank(x, mus, sigmas))
    refs = jnp.stack([jnp.exp(-((x - m) ** 2) / (2.0 * s ** 2))
                      for m, s in zip(mus, sigmas)])
    assert outs.shape == (len(mus),) + x.shape and outs.dtype == x.dtype
    assert jnp.allclose(outs, refs, atol=1e-6, rtol=1e-5)

    print("KERNEL_OK")
</pallas_src>

<mosaic_0001>
module attributes {stable_mosaic.version = 11 : i64} {
  func.func @_gaussian_body(%arg0: i32, %arg1: memref<4x512xf32, #tpu.memory_space<vmem>>, %arg2: memref<4x512xf32, #tpu.memory_space<vmem>>) attributes {dimension_semantics = [#tpu.dimension_semantics<parallel>], iteration_bounds = array<i64: 1>, scalar_prefetch = 0 : i64, scratch_operands = 0 : i64, tpu.core_type = #tpu.core_type<tc>, window_params = [{transform_indices = @transform_0, window_bounds = array<i64: 4, 512>}, {transform_indices = @transform_1, window_bounds = array<i64: 4, 512>}]} {
    %c0 = arith.constant 0 : index
    %c0_0 = arith.constant 0 : index
    %0 = vector.load %arg1[%c0, %c0_0] : memref<4x512xf32, #tpu.memory_space<vmem>>, vector<4x512xf32>
    %cst = arith.constant 1.000000e+00 : f32
    %1 = vector.broadcast %cst : f32 to vector<4x512xf32>
    %2 = arith.subf %0, %1 : vector<4x512xf32>
    %3 = arith.mulf %2, %2 : vector<4x512xf32>
    %cst_1 = arith.constant -5.000000e-01 : f32
    %4 = vector.broadcast %cst_1 : f32 to vector<4x512xf32>
    %5 = arith.mulf %3, %4 : vector<4x512xf32>
    %6 = math.exp %5 : vector<4x512xf32>
    %c0_2 = arith.constant 0 : index
    %c0_3 = arith.constant 0 : index
    %7 = vector.load %arg2[%c0_2, %c0_3] : memref<4x512xf32, #tpu.memory_space<vmem>>, vector<4x512xf32>
    tpu.vector_store %arg2[%c0_2, %c0_3], %6 {strides = array<i32>} : memref<4x512xf32, #tpu.memory_space<vmem>>, vector<4x512xf32>,
    return
  }
  func.func @transform_0(%arg0: i32) -> (i32, i32) {
    %c0_i32 = arith.constant 0 : i32
    %c0_i32_0 = arith.constant 0 : i32
    return %arg0, %c0_i32 : i32, i32
  }
  func.func @transform_1(%arg0: i32) -> (i32, i32) {
    %c0_i32 = arith.constant 0 : i32
    %c0_i32_0 = arith.constant 0 : i32
    return %arg0, %c0_i32 : i32, i32
  }
}

</mosaic_0001>

<bundles_post_ra>
// kernel: tpu_custom_call.1
= control target key start
LH: loop header
LB: loop body
LE: loop exit
PB: predicated region body
PF: predicated region fallthrough
CT: control target
= control target key end

     0   :  { %6 = vsyncpa [#allocation3], 0  ;;  %s142_s0 = inlined_call_operand.hbm [shape: f32[4,512], index: 0, kind: input, shape index: {}]   ;;  %s143_s1 = inlined_call_operand.hbm [shape: f32[4,512], index: 1, kind: output, shape index: {}]  }
   0x1   :  { %7 = vsyncpa [#allocation4], 0  ;;  %s106_s6 = smov [#allocation2]   ;;  %s58_s10 = scalar_lea.hbm %s142_s0, 256 }
   0x2   :  { %s14_s7 = sshll.u32 %s106_s6, 4  ;;  %p59_p0 = scmp.ne.s32.totalorder %s142_s0, %s58_s10  ;;  %s15_s7 = int_to_ptr.vmem [resolvable:$true] %s14_s7 }
   0x3   :  { %p62_p1 = scmp.lt.u32.totalorder %s58_s10, %s142_s0 }
   0x5   :  { %p64_p2 = pnand %p62_p1, %p59_p0 }
   0x7   :  { %67 = shalt.err (!%p64_p2)
}
   0x8   :  { %s68_s15 = scalar_lea.vmem %s15_s7, 256  ;;  %p73_p4 = scmp.lt.s32.totalorder %s15_s7, %s15_s7 }
   0x9   :  { %p69_p3 = scmp.ne.s32.totalorder %s15_s7, %s68_s15  ;;  %p74_p5 = scmp.lt.s32.totalorder %s68_s15, %s68_s15 }
   0xb   :  { %p75_p6 = por %p74_p5, %p73_p4 }
   0xd   :  { %p76_p7 = pnand %p75_p6, %p69_p3 }
   0xf   :  { %79 = shalt.err (!%p76_p7)
}
  0x10   :  { %17 = dma.hbm_to_vmem [thread:$0]  %s142_s0, 256, %s15_s7, [#allocation3]  }
  0x11   :  { %102 = dma.done.wait [#allocation3], 256  }
  0x12   :  { %103 = vsyncadd [#allocation3], 4294967040  ;;  %v21_v0 = vld [vmem:[#allocation2] sm:$0xff]  ;;  %v22_v1 = vld [vmem:[#allocation2 + $0x8] sm:$0xff]  ;;  %s107_s18 = smov [#allocation5]  }
  0x13   :  { %v50_v2 = vadd.f32 -1.0, %v21_v0  ;;  %v51_v3 = vadd.f32 -1.0, %v22_v1  ;;  %s41_s19 = sshll.u32 %s107_s18, 4  ;;  %s42_s19 = int_to_ptr.vmem [resolvable:$true] %s41_s19 }
  0x14   :  { %s80_s0 = scalar_lea.vmem %s42_s19, 256  ;;  %p85_p9 = scmp.lt.s32.totalorder %s42_s19, %s42_s19 }
  0x15   :  { %v25_v4 = vmul.f32 %v50_v2, %v50_v2  ;;  %v26_v5 = vmul.f32 %v51_v3, %v51_v3  ;;  %p81_p8 = scmp.ne.s32.totalorder %s42_s19, %s80_s0  ;;  %p86_p10 = scmp.lt.s32.totalorder %s80_s0, %s80_s0 }
  0x17   :  { %v27_v6 = vmul.f32 -0.5, %v25_v4  ;;  %v28_v7 = vmul.f32 -0.5, %v26_v5  ;;  %p87_p11 = por %p86_p10, %p85_p9 }
  0x19   :  { %v29_v8 = vmul.f32 1.442695, %v27_v6  ;;  %v31_v9 = vmul.f32 1.442695, %v28_v7  ;;  %p88_p12 = pnand %p87_p11, %p81_p8 }
  0x1b   :  { %54 = vpow2.f32 %v29_v8 }
  0x1c   :  { %56 = vpow2.f32 %v31_v9 }
  0x25   :  { %v55_v10 = vpop.eup %54 }
  0x26   :  { %v57_v11 = vpop.eup %56  ;;  %33 = vst [vmem:[#allocation5] sm:$0xff] %v55_v10 }
  0x27   :  { %34 = vst [vmem:[#allocation5 + $0x8] sm:$0xff] %v57_v11 }
  0x28   :  { %91 = shalt.err (!%p88_p12)
}
  0x29   :  { %s92_s22 = scalar_lea.hbm %s143_s1, 256 }
  0x2a   :  { %p93_p13 = scmp.ne.s32.totalorder %s143_s1, %s92_s22  ;;  %p96_p0 = scmp.lt.u32.totalorder %s92_s22, %s143_s1 }
  0x2c   :  { %p98_p1 = pnand %p96_p0, %p93_p13 }
  0x2e   :  { %101 = shalt.err (!%p98_p1)
}
  0x2f   :  { %44 = dma.vmem_to_hbm [thread:$0]  %s42_s19, 256, %s143_s1, [#allocation4]  }
  0x30   :  { %104 = dma.done.wait [#allocation4], 256  }
  0x31   :  { %105 = vsyncadd [#allocation4], 4294967040 }
  0x32   :  { %48 = vsyncpa [#allocation3], 1 }
  0x33   :  { %49 = vsyncpa [#allocation4], 1 }

</bundles_post_ra>
